<compile_context>
chip_gen: v7x
topology: tpu7x:2x2x1
jax: 0.10.0
libtpu: 0.0.40
codegen_flags: <defaults>
</compile_context>

<pallas_src>
import jax
import jax.numpy as jnp
from jax.experimental import pallas as pl
from jax.experimental.pallas import tpu as pltpu

_NEG_BIG = -1e30  # fill value for the table's lane padding


def bigram_kernel(ids_ref, table_ref, logits_ref, loss_ref):
    # ids_ref:    SMEM (2*N,) int32   [idx_0..idx_{N-1}, tgt_0..tgt_{N-1}]
    # table_ref:  VMEM (V, 1, VP) f32 (embedding table, pad lanes = -1e30)
    # logits_ref: VMEM (N, VP)   f32  (lane-dense padded logits)
    # loss_ref:   VMEM (1, 1)    f32  (mean cross-entropy)
    n, vp = logits_ref.shape

    lane = jax.lax.broadcasted_iota(jnp.int32, (1, vp), 1)

    # Gather: logits[i, :] = table[idx[i], :].  While the row is live in
    # registers, also accumulate the picked (target) logit for cross-entropy.
    pick_sum = jnp.zeros((1, 1), jnp.float32)
    for i in range(n):                            # static unroll; N is tiny
        tok = ids_ref[i]
        tgt = ids_ref[n + i]
        row = table_ref[tok]                      # (1, VP), leading-axis dyn idx
        logits_ref[pl.ds(i, 1), :] = row
        pick_sum = pick_sum + jnp.sum(
            jnp.where(lane == tgt, row, 0.0), axis=-1, keepdims=True)

    # Cross entropy: mean_i [ logsumexp(logits_i) - logits_i[target_i] ].
    # Pad lanes already carry -1e30, so no masking is needed here.
    logits = logits_ref[...]                                    # (N, VP)
    m = jnp.max(logits, axis=-1, keepdims=True)                 # (N, 1)
    p = jnp.exp(logits - m)                                     # pad lanes -> 0
    lse = m + jnp.log(jnp.sum(p, axis=-1, keepdims=True))       # (N, 1)
    lse_sum = jnp.sum(lse, axis=0, keepdims=True)               # (1, 1)
    loss_ref[...] = (lse_sum - pick_sum) * (1.0 / n)


def bigram_forward(idx, targets, table):
    """Mirrors BigramLanguageModel.forward(idx, targets)."""
    B, T = idx.shape
    V = table.shape[0]
    N = B * T
    VP = ((V + 127) // 128) * 128                 # lane-dense padded vocab width

    # TODO(synk): for non-toy N add a parallel grid over the token axis
    # (grid=(pl.cdiv(N, 256),), dimension_semantics=("parallel",)) so v7x can
    # shard rows over both TensorCores, and tile / DMA-gather the table when
    # V*VP*4 bytes no longer fits comfortably in VMEM (64 MiB on v7x).

    loss_requested = targets is not None
    tgt = targets if loss_requested else jnp.zeros_like(idx)

    ids = jnp.concatenate(
        [idx.reshape(N), tgt.reshape(N)]).astype(jnp.int32)            # (2N,)
    table_p = jnp.pad(table.astype(jnp.float32),
                      ((0, 0), (0, VP - V)),
                      constant_values=_NEG_BIG).reshape(V, 1, VP)

    logits_p, loss = pl.pallas_call(
        bigram_kernel,
        out_shape=(
            jax.ShapeDtypeStruct((N, VP), jnp.float32),
            jax.ShapeDtypeStruct((1, 1), jnp.float32),
        ),
        in_specs=[
            pl.BlockSpec(memory_space=pltpu.SMEM),    # merged idx/targets
            pl.BlockSpec(memory_space=pltpu.VMEM),    # padded embedding table
        ],
        out_specs=(
            pl.BlockSpec(memory_space=pltpu.VMEM),    # lane-dense logits
            pl.BlockSpec(memory_space=pltpu.VMEM),    # scalar loss
        ),
        cost_estimate=pl.CostEstimate(
            flops=6 * N * VP,
            transcendentals=2 * N * VP,
            bytes_accessed=(V * VP + N * VP + 1) * 4 + 2 * N * 4,
        ),
    )(ids, table_p)

    logits_flat = logits_p[:, :V]                                 # (N, V)
    if loss_requested:
        # PyTorch returns the flattened (B*T, C) view alongside the loss.
        return logits_flat, loss[0, 0]
    return logits_flat.reshape(B, T, V), None


def _reference(idx, targets, table):
    logits = table[idx]                                    # (B, T, V)
    B, T, V = logits.shape
    lf = logits.reshape(B * T, V)
    tf = targets.reshape(B * T)
    lse = jax.nn.logsumexp(lf, axis=-1)
    picked = jnp.take_along_axis(lf, tf[:, None], axis=-1)[:, 0]
    return logits, jnp.mean(lse - picked)


if __name__ == "__main__":
    key = jax.random.PRNGKey(0)
    vocab_size = 65     # e.g. tiny-shakespeare char vocab
    B, T = 2, 8

    k_emb, k_idx, k_tgt = jax.random.split(key, 3)
    # nn.Embedding default init: N(0, 1)
    table = jax.random.normal(k_emb, (vocab_size, vocab_size), dtype=jnp.float32)
    idx = jax.random.randint(k_idx, (B, T), 0, vocab_size, dtype=jnp.int32)
    targets = jax.random.randint(k_tgt, (B, T), 0, vocab_size, dtype=jnp.int32)

    # Path 1: targets provided -> (logits.view(B*T, C), loss), like PyTorch.
    logits_flat, loss = bigram_forward(idx, targets, table)
    jax.block_until_ready((logits_flat, loss))

    ref_logits, ref_loss = _reference(idx, targets, table)
    assert logits_flat.shape == (B * T, vocab_size)
    assert jnp.allclose(logits_flat,
                        ref_logits.reshape(B * T, vocab_size), atol=1e-5)
    assert jnp.allclose(loss, ref_loss, atol=1e-5)

    # Path 2: targets=None -> ((B, T, C) logits, None), like PyTorch.
    logits_only, no_loss = bigram_forward(idx, None, table)
    jax.block_until_ready(logits_only)
    assert no_loss is None
    assert logits_only.shape == (B, T, vocab_size)
    assert jnp.allclose(logits_only, ref_logits, atol=1e-5)

    print("KERNEL_OK")
</pallas_src>

<mosaic_0001>
module attributes {stable_mosaic.version = 11 : i64} {
  func.func @bigram_kernel(%arg0: memref<32xi32, #tpu.memory_space<smem>>, %arg1: memref<65x1x128xf32, #tpu.memory_space<vmem>>, %arg2: memref<16x128xf32, #tpu.memory_space<vmem>>, %arg3: memref<1x1xf32, #tpu.memory_space<vmem>>) attributes {dimension_semantics = [], scalar_prefetch = 0 : i64, scratch_operands = 0 : i64, tpu.core_type = #tpu.core_type<tc>} {
    %0 = tpu.iota {dimensions = array<i32: 1>} : vector<1x128xi32>
    %cst = arith.constant 0.000000e+00 : f32
    %1 = vector.broadcast %cst : f32 to vector<1x1xf32>
    %c0 = arith.constant 0 : index
    %2 = memref.load %arg0[%c0] : memref<32xi32, #tpu.memory_space<smem>>
    %c16 = arith.constant 16 : index
    %3 = memref.load %arg0[%c16] : memref<32xi32, #tpu.memory_space<smem>>
    %4 = arith.index_cast %2 : i32 to index
    %c0_0 = arith.constant 0 : index
    %c0_1 = arith.constant 0 : index
    %5 = vector.load %arg1[%4, %c0_0, %c0_1] : memref<65x1x128xf32, #tpu.memory_space<vmem>>, vector<1x1x128xf32>
    %6 = vector.shape_cast %5 : vector<1x1x128xf32> to vector<1x128xf32>
    %c0_2 = arith.constant 0 : index
    %c0_3 = arith.constant 0 : index
    %7 = vector.load %arg2[%c0_2, %c0_3] : memref<16x128xf32, #tpu.memory_space<vmem>>, vector<1x128xf32>
    tpu.vector_store %arg2[%c0_2, %c0_3], %6 {strides = array<i32>} : memref<16x128xf32, #tpu.memory_space<vmem>>, vector<1x128xf32>,
    %8 = vector.broadcast %3 : i32 to vector<1x128xi32>
    %9 = arith.cmpi eq, %0, %8 : vector<1x128xi32>
    %cst_4 = arith.constant 0.000000e+00 : f32
    %10 = vector.broadcast %cst_4 : f32 to vector<1x128xf32>
    %11 = arith.select %9, %6, %10 : vector<1x128xi1>, vector<1x128xf32>
    %cst_5 = arith.constant dense<0.000000e+00> : vector<1xf32>
    %12 = vector.multi_reduction <add>, %11, %cst_5 [1] : vector<1x128xf32> to vector<1xf32>
    %13 = vector.shape_cast %12 : vector<1xf32> to vector<1x1xf32>
    %14 = arith.addf %1, %13 : vector<1x1xf32>
    %c1 = arith.constant 1 : index
    %15 = memref.load %arg0[%c1] : memref<32xi32, #tpu.memory_space<smem>>
    %c17 = arith.constant 17 : index
    %16 = memref.load %arg0[%c17] : memref<32xi32, #tpu.memory_space<smem>>
    %17 = arith.index_cast %15 : i32 to index
    %c0_6 = arith.constant 0 : index
    %c0_7 = arith.constant 0 : index
    %18 = vector.load %arg1[%17, %c0_6, %c0_7] : memref<65x1x128xf32, #tpu.memory_space<vmem>>, vector<1x1x128xf32>
    %19 = vector.shape_cast %18 : vector<1x1x128xf32> to vector<1x128xf32>
    %c1_8 = arith.constant 1 : index
    %c0_9 = arith.constant 0 : index
    %20 = vector.load %arg2[%c1_8, %c0_9] : memref<16x128xf32, #tpu.memory_space<vmem>>, vector<1x128xf32>
    tpu.vector_store %arg2[%c1_8, %c0_9], %19 {strides = array<i32>} : memref<16x128xf32, #tpu.memory_space<vmem>>, vector<1x128xf32>,
    %21 = vector.broadcast %16 : i32 to vector<1x128xi32>
    %22 = arith.cmpi eq, %0, %21 : vector<1x128xi32>
    %cst_10 = arith.constant 0.000000e+00 : f32
    %23 = vector.broadcast %cst_10 : f32 to vector<1x128xf32>
    %24 = arith.select %22, %19, %23 : vector<1x128xi1>, vector<1x128xf32>
    %cst_11 = arith.constant dense<0.000000e+00> : vector<1xf32>
    %25 = vector.multi_reduction <add>, %24, %cst_11 [1] : vector<1x128xf32> to vector<1xf32>
    %26 = vector.shape_cast %25 : vector<1xf32> to vector<1x1xf32>
    %27 = arith.addf %14, %26 : vector<1x1xf32>
    %c2 = arith.constant 2 : index
    %28 = memref.load %arg0[%c2] : memref<32xi32, #tpu.memory_space<smem>>
    %c18 = arith.constant 18 : index
    %29 = memref.load %arg0[%c18] : memref<32xi32, #tpu.memory_space<smem>>
    %30 = arith.index_cast %28 : i32 to index
    %c0_12 = arith.constant 0 : index
    %c0_13 = arith.constant 0 : index
    %31 = vector.load %arg1[%30, %c0_12, %c0_13] : memref<65x1x128xf32, #tpu.memory_space<vmem>>, vector<1x1x128xf32>
    %32 = vector.shape_cast %31 : vector<1x1x128xf32> to vector<1x128xf32>
    %c2_14 = arith.constant 2 : index
    %c0_15 = arith.constant 0 : index
    %33 = vector.load %arg2[%c2_14, %c0_15] : memref<16x128xf32, #tpu.memory_space<vmem>>, vector<1x128xf32>
    tpu.vector_store %arg2[%c2_14, %c0_15], %32 {strides = array<i32>} : memref<16x128xf32, #tpu.memory_space<vmem>>, vector<1x128xf32>,
    %34 = vector.broadcast %29 : i32 to vector<1x128xi32>
    %35 = arith.cmpi eq, %0, %34 : vector<1x128xi32>
    %cst_16 = arith.constant 0.000000e+00 : f32
    %36 = vector.broadcast %cst_16 : f32 to vector<1x128xf32>
    %37 = arith.select %35, %32, %36 : vector<1x128xi1>, vector<1x128xf32>
    %cst_17 = arith.constant dense<0.000000e+00> : vector<1xf32>
    %38 = vector.multi_reduction <add>, %37, %cst_17 [1] : vector<1x128xf32> to vector<1xf32>
    %39 = vector.shape_cast %38 : vector<1xf32> to vector<1x1xf32>
    %40 = arith.addf %27, %39 : vector<1x1xf32>
    %c3 = arith.constant 3 : index
    %41 = memref.load %arg0[%c3] : memref<32xi32, #tpu.memory_space<smem>>
    %c19 = arith.constant 19 : index
    %42 = memref.load %arg0[%c19] : memref<32xi32, #tpu.memory_space<smem>>
    %43 = arith.index_cast %41 : i32 to index
    %c0_18 = arith.constant 0 : index
    %c0_19 = arith.constant 0 : index
    %44 = vector.load %arg1[%43, %c0_18, %c0_19] : memref<65x1x128xf32, #tpu.memory_space<vmem>>, vector<1x1x128xf32>
    %45 = vector.shape_cast %44 : vector<1x1x128xf32> to vector<1x128xf32>
    %c3_20 = arith.constant 3 : index
    %c0_21 = arith.constant 0 : index
    %46 = vector.load %arg2[%c3_20, %c0_21] : memref<16x128xf32, #tpu.memory_space<vmem>>, vector<1x128xf32>
    tpu.vector_store %arg2[%c3_20, %c0_21], %45 {strides = array<i32>} : memref<16x128xf32, #tpu.memory_space<vmem>>, vector<1x128xf32>,
    %47 = vector.broadcast %42 : i32 to vector<1x128xi32>
    %48 = arith.cmpi eq, %0, %47 : vector<1x128xi32>
    %cst_22 = arith.constant 0.000000e+00 : f32
    %49 = vector.broadcast %cst_22 : f32 to vector<1x128xf32>
    %50 = arith.select %48, %45, %49 : vector<1x128xi1>, vector<1x128xf32>
    %cst_23 = arith.constant dense<0.000000e+00> : vector<1xf32>
    %51 = vector.multi_reduction <add>, %50, %cst_23 [1] : vector<1x128xf32> to vector<1xf32>
    %52 = vector.shape_cast %51 : vector<1xf32> to vector<1x1xf32>
    %53 = arith.addf %40, %52 : vector<1x1xf32>
    %c4 = arith.constant 4 : index
    %54 = memref.load %arg0[%c4] : memref<32xi32, #tpu.memory_space<smem>>
    %c20 = arith.constant 20 : index
    %55 = memref.load %arg0[%c20] : memref<32xi32, #tpu.memory_space<smem>>
    %56 = arith.index_cast %54 : i32 to index
    %c0_24 = arith.constant 0 : index
    %c0_25 = arith.constant 0 : index
    %57 = vector.load %arg1[%56, %c0_24, %c0_25] : memref<65x1x128xf32, #tpu.memory_space<vmem>>, vector<1x1x128xf32>
    %58 = vector.shape_cast %57 : vector<1x1x128xf32> to vector<1x128xf32>
    %c4_26 = arith.constant 4 : index
    %c0_27 = arith.constant 0 : index
    %59 = vector.load %arg2[%c4_26, %c0_27] : memref<16x128xf32, #tpu.memory_space<vmem>>, vector<1x128xf32>
    tpu.vector_store %arg2[%c4_26, %c0_27], %58 {strides = array<i32>} : memref<16x128xf32, #tpu.memory_space<vmem>>, vector<1x128xf32>,
    %60 = vector.broadcast %55 : i32 to vector<1x128xi32>
    %61 = arith.cmpi eq, %0, %60 : vector<1x128xi32>
    %cst_28 = arith.constant 0.000000e+00 : f32
    %62 = vector.broadcast %cst_28 : f32 to vector<1x128xf32>
    %63 = arith.select %61, %58, %62 : vector<1x128xi1>, vector<1x128xf32>
    %cst_29 = arith.constant dense<0.000000e+00> : vector<1xf32>
    %64 = vector.multi_reduction <add>, %63, %cst_29 [1] : vector<1x128xf32> to vector<1xf32>
    %65 = vector.shape_cast %64 : vector<1xf32> to vector<1x1xf32>
    %66 = arith.addf %53, %65 : vector<1x1xf32>
    %c5 = arith.constant 5 : index
    %67 = memref.load %arg0[%c5] : memref<32xi32, #tpu.memory_space<smem>>
    %c21 = arith.constant 21 : index
    %68 = memref.load %arg0[%c21] : memref<32xi32, #tpu.memory_space<smem>>
    %69 = arith.index_cast %67 : i32 to index
    %c0_30 = arith.constant 0 : index
    %c0_31 = arith.constant 0 : index
    %70 = vector.load %arg1[%69, %c0_30, %c0_31] : memref<65x1x128xf32, #tpu.memory_space<vmem>>, vector<1x1x128xf32>
    %71 = vector.shape_cast %70 : vector<1x1x128xf32> to vector<1x128xf32>
    %c5_32 = arith.constant 5 : index
    %c0_33 = arith.constant 0 : index
    %72 = vector.load %arg2[%c5_32, %c0_33] : memref<16x128xf32, #tpu.memory_space<vmem>>, vector<1x128xf32>
    tpu.vector_store %arg2[%c5_32, %c0_33], %71 {strides = array<i32>} : memref<16x128xf32, #tpu.memory_space<vmem>>, vector<1x128xf32>,
    %73 = vector.broadcast %68 : i32 to vector<1x128xi32>
    %74 = arith.cmpi eq, %0, %73 : vector<1x128xi32>
    %cst_34 = arith.constant 0.000000e+00 : f32
    %75 = vector.broadcast %cst_34 : f32 to vector<1x128xf32>
    %76 = arith.select %74, %71, %75 : vector<1x128xi1>, vector<1x128xf32>
    %cst_35 = arith.constant dense<0.000000e+00> : vector<1xf32>
    %77 = vector.multi_reduction <add>, %76, %cst_35 [1] : vector<1x128xf32> to vector<1xf32>
    %78 = vector.shape_cast %77 : vector<1xf32> to vector<1x1xf32>
    %79 = arith.addf %66, %78 : vector<1x1xf32>
    %c6 = arith.constant 6 : index
    %80 = memref.load %arg0[%c6] : memref<32xi32, #tpu.memory_space<smem>>
    %c22 = arith.constant 22 : index
    %81 = memref.load %arg0[%c22] : memref<32xi32, #tpu.memory_space<smem>>
    %82 = arith.index_cast %80 : i32 to index
    %c0_36 = arith.constant 0 : index
    %c0_37 = arith.constant 0 : index
    %83 = vector.load %arg1[%82, %c0_36, %c0_37] : memref<65x1x128xf32, #tpu.memory_space<vmem>>, vector<1x1x128xf32>
    %84 = vector.shape_cast %83 : vector<1x1x128xf32> to vector<1x128xf32>
    %c6_38 = arith.constant 6 : index
    %c0_39 = arith.constant 0 : index
    %85 = vector.load %arg2[%c6_38, %c0_39] : memref<16x128xf32, #tpu.memory_space<vmem>>, vector<1x128xf32>
    tpu.vector_store %arg2[%c6_38, %c0_39], %84 {strides = array<i32>} : memref<16x128xf32, #tpu.memory_space<vmem>>, vector<1x128xf32>,
    %86 = vector.broadcast %81 : i32 to vector<1x128xi32>
    %87 = arith.cmpi eq, %0, %86 : vector<1x128xi32>
    %cst_40 = arith.constant 0.000000e+00 : f32
    %88 = vector.broadcast %cst_40 : f32 to vector<1x128xf32>
    %89 = arith.select %87, %84, %88 : vector<1x128xi1>, vector<1x128xf32>
    %cst_41 = arith.constant dense<0.000000e+00> : vector<1xf32>
    %90 = vector.multi_reduction <add>, %89, %cst_41 [1] : vector<1x128xf32> to vector<1xf32>
    %91 = vector.shape_cast %90 : vector<1xf32> to vector<1x1xf32>
    %92 = arith.addf %79, %91 : vector<1x1xf32>
    %c7 = arith.constant 7 : index
    %93 = memref.load %arg0[%c7] : memref<32xi32, #tpu.memory_space<smem>>
    %c23 = arith.constant 23 : index
    %94 = memref.load %arg0[%c23] : memref<32xi32, #tpu.memory_space<smem>>
    %95 = arith.index_cast %93 : i32 to index
    %c0_42 = arith.constant 0 : index
    %c0_43 = arith.constant 0 : index
    %96 = vector.load %arg1[%95, %c0_42, %c0_43] : memref<65x1x128xf32, #tpu.memory_space<vmem>>, vector<1x1x128xf32>
    %97 = vector.shape_cast %96 : vector<1x1x128xf32> to vector<1x128xf32>
    %c7_44 = arith.constant 7 : index
    %c0_45 = arith.constant 0 : index
    %98 = vector.load %arg2[%c7_44, %c0_45] : memref<16x128xf32, #tpu.memory_space<vmem>>, vector<1x128xf32>
    tpu.vector_store %arg2[%c7_44, %c0_45], %97 {strides = array<i32>} : memref<16x128xf32, #tpu.memory_space<vmem>>, vector<1x128xf32>,
    %99 = vector.broadcast %94 : i32 to vector<1x128xi32>
    %100 = arith.cmpi eq, %0, %99 : vector<1x128xi32>
    %cst_46 = arith.constant 0.000000e+00 : f32
    %101 = vector.broadcast %cst_46 : f32 to vector<1x128xf32>
    %102 = arith.select %100, %97, %101 : vector<1x128xi1>, vector<1x128xf32>
    %cst_47 = arith.constant dense<0.000000e+00> : vector<1xf32>
    %103 = vector.multi_reduction <add>, %102, %cst_47 [1] : vector<1x128xf32> to vector<1xf32>
    %104 = vector.shape_cast %103 : vector<1xf32> to vector<1x1xf32>
    %105 = arith.addf %92, %104 : vector<1x1xf32>
    %c8 = arith.constant 8 : index
    %106 = memref.load %arg0[%c8] : memref<32xi32, #tpu.memory_space<smem>>
    %c24 = arith.constant 24 : index
    %107 = memref.load %arg0[%c24] : memref<32xi32, #tpu.memory_space<smem>>
    %108 = arith.index_cast %106 : i32 to index
    %c0_48 = arith.constant 0 : index
    %c0_49 = arith.constant 0 : index
    %109 = vector.load %arg1[%108, %c0_48, %c0_49] : memref<65x1x128xf32, #tpu.memory_space<vmem>>, vector<1x1x128xf32>
    %110 = vector.shape_cast %109 : vector<1x1x128xf32> to vector<1x128xf32>
    %c8_50 = arith.constant 8 : index
    %c0_51 = arith.constant 0 : index
    %111 = vector.load %arg2[%c8_50, %c0_51] : memref<16x128xf32, #tpu.memory_space<vmem>>, vector<1x128xf32>
    tpu.vector_store %arg2[%c8_50, %c0_51], %110 {strides = array<i32>} : memref<16x128xf32, #tpu.memory_space<vmem>>, vector<1x128xf32>,
    %112 = vector.broadcast %107 : i32 to vector<1x128xi32>
    %113 = arith.cmpi eq, %0, %112 : vector<1x128xi32>
    %cst_52 = arith.constant 0.000000e+00 : f32
    %114 = vector.broadcast %cst_52 : f32 to vector<1x128xf32>
    %115 = arith.select %113, %110, %114 : vector<1x128xi1>, vector<1x128xf32>
    %cst_53 = arith.constant dense<0.000000e+00> : vector<1xf32>
    %116 = vector.multi_reduction <add>, %115, %cst_53 [1] : vector<1x128xf32> to vector<1xf32>
    %117 = vector.shape_cast %116 : vector<1xf32> to vector<1x1xf32>
    %118 = arith.addf %105, %117 : vector<1x1xf32>
    %c9 = arith.constant 9 : index
    %119 = memref.load %arg0[%c9] : memref<32xi32, #tpu.memory_space<smem>>
    %c25 = arith.constant 25 : index
    %120 = memref.load %arg0[%c25] : memref<32xi32, #tpu.memory_space<smem>>
    %121 = arith.index_cast %119 : i32 to index
    %c0_54 = arith.constant 0 : index
    %c0_55 = arith.constant 0 : index
    %122 = vector.load %arg1[%121, %c0_54, %c0_55] : memref<65x1x128xf32, #tpu.memory_space<vmem>>, vector<1x1x128xf32>
    %123 = vector.shape_cast %122 : vector<1x1x128xf32> to vector<1x128xf32>
    %c9_56 = arith.constant 9 : index
    %c0_57 = arith.constant 0 : index
    %124 = vector.load %arg2[%c9_56, %c0_57] : memref<16x128xf32, #tpu.memory_space<vmem>>, vector<1x128xf32>
    tpu.vector_store %arg2[%c9_56, %c0_57], %123 {strides = array<i32>} : memref<16x128xf32, #tpu.memory_space<vmem>>, vector<1x128xf32>,
    %125 = vector.broadcast %120 : i32 to vector<1x128xi32>
    %126 = arith.cmpi eq, %0, %125 : vector<1x128xi32>
    %cst_58 = arith.constant 0.000000e+00 : f32
    %127 = vector.broadcast %cst_58 : f32 to vector<1x128xf32>
    %128 = arith.select %126, %123, %127 : vector<1x128xi1>, vector<1x128xf32>
    %cst_59 = arith.constant dense<0.000000e+00> : vector<1xf32>
    %129 = vector.multi_reduction <add>, %128, %cst_59 [1] : vector<1x128xf32> to vector<1xf32>
    %130 = vector.shape_cast %129 : vector<1xf32> to vector<1x1xf32>
    %131 = arith.addf %118, %130 : vector<1x1xf32>
    %c10 = arith.constant 10 : index
    %132 = memref.load %arg0[%c10] : memref<32xi32, #tpu.memory_space<smem>>
    %c26 = arith.constant 26 : index
    %133 = memref.load %arg0[%c26] : memref<32xi32, #tpu.memory_space<smem>>
    %134 = arith.index_cast %132 : i32 to index
    %c0_60 = arith.constant 0 : index
    %c0_61 = arith.constant 0 : index
    %135 = vector.load %arg1[%134, %c0_60, %c0_61] : memref<65x1x128xf32, #tpu.memory_space<vmem>>, vector<1x1x128xf32>
    %136 = vector.shape_cast %135 : vector<1x1x128xf32> to vector<1x128xf32>
    %c10_62 = arith.constant 10 : index
    %c0_63 = arith.constant 0 : index
    %137 = vector.load %arg2[%c10_62, %c0_63] : memref<16x128xf32, #tpu.memory_space<vmem>>, vector<1x128xf32>
    tpu.vector_store %arg2[%c10_62, %c0_63], %136 {strides = array<i32>} : memref<16x128xf32, #tpu.memory_space<vmem>>, vector<1x128xf32>,
    %138 = vector.broadcast %133 : i32 to vector<1x128xi32>
    %139 = arith.cmpi eq, %0, %138 : vector<1x128xi32>
    %cst_64 = arith.constant 0.000000e+00 : f32
    %140 = vector.broadcast %cst_64 : f32 to vector<1x128xf32>
    %141 = arith.select %139, %136, %140 : vector<1x128xi1>, vector<1x128xf32>
    %cst_65 = arith.constant dense<0.000000e+00> : vector<1xf32>
    %142 = vector.multi_reduction <add>, %141, %cst_65 [1] : vector<1x128xf32> to vector<1xf32>
    %143 = vector.shape_cast %142 : vector<1xf32> to vector<1x1xf32>
    %144 = arith.addf %131, %143 : vector<1x1xf32>
    %c11 = arith.constant 11 : index
    %145 = memref.load %arg0[%c11] : memref<32xi32, #tpu.memory_space<smem>>
    %c27 = arith.constant 27 : index
    %146 = memref.load %arg0[%c27] : memref<32xi32, #tpu.memory_space<smem>>
    %147 = arith.index_cast %145 : i32 to index
    %c0_66 = arith.constant 0 : index
    %c0_67 = arith.constant 0 : index
    %148 = vector.load %arg1[%147, %c0_66, %c0_67] : memref<65x1x128xf32, #tpu.memory_space<vmem>>, vector<1x1x128xf32>
    %149 = vector.shape_cast %148 : vector<1x1x128xf32> to vector<1x128xf32>
    %c11_68 = arith.constant 11 : index
    %c0_69 = arith.constant 0 : index
    %150 = vector.load %arg2[%c11_68, %c0_69] : memref<16x128xf32, #tpu.memory_space<vmem>>, vector<1x128xf32>
    tpu.vector_store %arg2[%c11_68, %c0_69], %149 {strides = array<i32>} : memref<16x128xf32, #tpu.memory_space<vmem>>, vector<1x128xf32>,
    %151 = vector.broadcast %146 : i32 to vector<1x128xi32>
    %152 = arith.cmpi eq, %0, %151 : vector<1x128xi32>
    %cst_70 = arith.constant 0.000000e+00 : f32
    %153 = vector.broadcast %cst_70 : f32 to vector<1x128xf32>
    %154 = arith.select %152, %149, %153 : vector<1x128xi1>, vector<1x128xf32>
    %cst_71 = arith.constant dense<0.000000e+00> : vector<1xf32>
    %155 = vector.multi_reduction <add>, %154, %cst_71 [1] : vector<1x128xf32> to vector<1xf32>
    %156 = vector.shape_cast %155 : vector<1xf32> to vector<1x1xf32>
    %157 = arith.addf %144, %156 : vector<1x1xf32>
    %c12 = arith.constant 12 : index
    %158 = memref.load %arg0[%c12] : memref<32xi32, #tpu.memory_space<smem>>
    %c28 = arith.constant 28 : index
    %159 = memref.load %arg0[%c28] : memref<32xi32, #tpu.memory_space<smem>>
    %160 = arith.index_cast %158 : i32 to index
    %c0_72 = arith.constant 0 : index
    %c0_73 = arith.constant 0 : index
    %161 = vector.load %arg1[%160, %c0_72, %c0_73] : memref<65x1x128xf32, #tpu.memory_space<vmem>>, vector<1x1x128xf32>
    %162 = vector.shape_cast %161 : vector<1x1x128xf32> to vector<1x128xf32>
    %c12_74 = arith.constant 12 : index
    %c0_75 = arith.constant 0 : index
    %163 = vector.load %arg2[%c12_74, %c0_75] : memref<16x128xf32, #tpu.memory_space<vmem>>, vector<1x128xf32>
    tpu.vector_store %arg2[%c12_74, %c0_75], %162 {strides = array<i32>} : memref<16x128xf32, #tpu.memory_space<vmem>>, vector<1x128xf32>,
    %164 = vector.broadcast %159 : i32 to vector<1x128xi32>
    %165 = arith.cmpi eq, %0, %164 : vector<1x128xi32>
    %cst_76 = arith.constant 0.000000e+00 : f32
    %166 = vector.broadcast %cst_76 : f32 to vector<1x128xf32>
    %167 = arith.select %165, %162, %166 : vector<1x128xi1>, vector<1x128xf32>
    %cst_77 = arith.constant dense<0.000000e+00> : vector<1xf32>
    %168 = vector.multi_reduction <add>, %167, %cst_77 [1] : vector<1x128xf32> to vector<1xf32>
    %169 = vector.shape_cast %168 : vector<1xf32> to vector<1x1xf32>
    %170 = arith.addf %157, %169 : vector<1x1xf32>
    %c13 = arith.constant 13 : index
    %171 = memref.load %arg0[%c13] : memref<32xi32, #tpu.memory_space<smem>>
    %c29 = arith.constant 29 : index
    %172 = memref.load %arg0[%c29] : memref<32xi32, #tpu.memory_space<smem>>
    %173 = arith.index_cast %171 : i32 to index
    %c0_78 = arith.constant 0 : index
    %c0_79 = arith.constant 0 : index
    %174 = vector.load %arg1[%173, %c0_78, %c0_79] : memref<65x1x128xf32, #tpu.memory_space<vmem>>, vector<1x1x128xf32>
    %175 = vector.shape_cast %174 : vector<1x1x128xf32> to vector<1x128xf32>
    %c13_80 = arith.constant 13 : index
    %c0_81 = arith.constant 0 : index
    %176 = vector.load %arg2[%c13_80, %c0_81] : memref<16x128xf32, #tpu.memory_space<vmem>>, vector<1x128xf32>
    tpu.vector_store %arg2[%c13_80, %c0_81], %175 {strides = array<i32>} : memref<16x128xf32, #tpu.memory_space<vmem>>, vector<1x128xf32>,
    %177 = vector.broadcast %172 : i32 to vector<1x128xi32>
    %178 = arith.cmpi eq, %0, %177 : vector<1x128xi32>
    %cst_82 = arith.constant 0.000000e+00 : f32
    %179 = vector.broadcast %cst_82 : f32 to vector<1x128xf32>
    %180 = arith.select %178, %175, %179 : vector<1x128xi1>, vector<1x128xf32>
    %cst_83 = arith.constant dense<0.000000e+00> : vector<1xf32>
    %181 = vector.multi_reduction <add>, %180, %cst_83 [1] : vector<1x128xf32> to vector<1xf32>
    %182 = vector.shape_cast %181 : vector<1xf32> to vector<1x1xf32>
    %183 = arith.addf %170, %182 : vector<1x1xf32>
    %c14 = arith.constant 14 : index
    %184 = memref.load %arg0[%c14] : memref<32xi32, #tpu.memory_space<smem>>
    %c30 = arith.constant 30 : index
    %185 = memref.load %arg0[%c30] : memref<32xi32, #tpu.memory_space<smem>>
    %186 = arith.index_cast %184 : i32 to index
    %c0_84 = arith.constant 0 : index
    %c0_85 = arith.constant 0 : index
    %187 = vector.load %arg1[%186, %c0_84, %c0_85] : memref<65x1x128xf32, #tpu.memory_space<vmem>>, vector<1x1x128xf32>
    %188 = vector.shape_cast %187 : vector<1x1x128xf32> to vector<1x128xf32>
    %c14_86 = arith.constant 14 : index
    %c0_87 = arith.constant 0 : index
    %189 = vector.load %arg2[%c14_86, %c0_87] : memref<16x128xf32, #tpu.memory_space<vmem>>, vector<1x128xf32>
    tpu.vector_store %arg2[%c14_86, %c0_87], %188 {strides = array<i32>} : memref<16x128xf32, #tpu.memory_space<vmem>>, vector<1x128xf32>,
    %190 = vector.broadcast %185 : i32 to vector<1x128xi32>
    %191 = arith.cmpi eq, %0, %190 : vector<1x128xi32>
    %cst_88 = arith.constant 0.000000e+00 : f32
    %192 = vector.broadcast %cst_88 : f32 to vector<1x128xf32>
    %193 = arith.select %191, %188, %192 : vector<1x128xi1>, vector<1x128xf32>
    %cst_89 = arith.constant dense<0.000000e+00> : vector<1xf32>
    %194 = vector.multi_reduction <add>, %193, %cst_89 [1] : vector<1x128xf32> to vector<1xf32>
    %195 = vector.shape_cast %194 : vector<1xf32> to vector<1x1xf32>
    %196 = arith.addf %183, %195 : vector<1x1xf32>
    %c15 = arith.constant 15 : index
    %197 = memref.load %arg0[%c15] : memref<32xi32, #tpu.memory_space<smem>>
    %c31 = arith.constant 31 : index
    %198 = memref.load %arg0[%c31] : memref<32xi32, #tpu.memory_space<smem>>
    %199 = arith.index_cast %197 : i32 to index
    %c0_90 = arith.constant 0 : index
    %c0_91 = arith.constant 0 : index
    %200 = vector.load %arg1[%199, %c0_90, %c0_91] : memref<65x1x128xf32, #tpu.memory_space<vmem>>, vector<1x1x128xf32>
    %201 = vector.shape_cast %200 : vector<1x1x128xf32> to vector<1x128xf32>
    %c15_92 = arith.constant 15 : index
    %c0_93 = arith.constant 0 : index
    %202 = vector.load %arg2[%c15_92, %c0_93] : memref<16x128xf32, #tpu.memory_space<vmem>>, vector<1x128xf32>
    tpu.vector_store %arg2[%c15_92, %c0_93], %201 {strides = array<i32>} : memref<16x128xf32, #tpu.memory_space<vmem>>, vector<1x128xf32>,
    %203 = vector.broadcast %198 : i32 to vector<1x128xi32>
    %204 = arith.cmpi eq, %0, %203 : vector<1x128xi32>
    %cst_94 = arith.constant 0.000000e+00 : f32
    %205 = vector.broadcast %cst_94 : f32 to vector<1x128xf32>
    %206 = arith.select %204, %201, %205 : vector<1x128xi1>, vector<1x128xf32>
    %cst_95 = arith.constant dense<0.000000e+00> : vector<1xf32>
    %207 = vector.multi_reduction <add>, %206, %cst_95 [1] : vector<1x128xf32> to vector<1xf32>
    %208 = vector.shape_cast %207 : vector<1xf32> to vector<1x1xf32>
    %209 = arith.addf %196, %208 : vector<1x1xf32>
    %c0_96 = arith.constant 0 : index
    %c0_97 = arith.constant 0 : index
    %210 = vector.load %arg2[%c0_96, %c0_97] : memref<16x128xf32, #tpu.memory_space<vmem>>, vector<16x128xf32>
    %cst_98 = arith.constant dense<0xFF800000> : vector<16xf32>
    %211 = vector.multi_reduction <maximumf>, %210, %cst_98 [1] : vector<16x128xf32> to vector<16xf32>
    %212 = vector.shape_cast %211 : vector<16xf32> to vector<16x1xf32>
    %213 = vector.broadcast %212 : vector<16x1xf32> to vector<16x128xf32>
    %214 = arith.subf %210, %213 : vector<16x128xf32>
    %215 = math.exp %214 : vector<16x128xf32>
    %cst_99 = arith.constant dense<0.000000e+00> : vector<16xf32>
    %216 = vector.multi_reduction <add>, %215, %cst_99 [1] : vector<16x128xf32> to vector<16xf32>
    %217 = vector.shape_cast %216 : vector<16xf32> to vector<16x1xf32>
    %218 = math.log %217 : vector<16x1xf32>
    %219 = arith.addf %212, %218 : vector<16x1xf32>
    %cst_100 = arith.constant dense<0.000000e+00> : vector<1xf32>
    %220 = vector.multi_reduction <add>, %219, %cst_100 [0] : vector<16x1xf32> to vector<1xf32>
    %221 = vector.shape_cast %220 : vector<1xf32> to vector<1x1xf32>
    %222 = arith.subf %221, %209 : vector<1x1xf32>
    %cst_101 = arith.constant 6.250000e-02 : f32
    %223 = vector.broadcast %cst_101 : f32 to vector<1x1xf32>
    %224 = arith.mulf %222, %223 : vector<1x1xf32>
    %c0_102 = arith.constant 0 : index
    %c0_103 = arith.constant 0 : index
    %225 = vector.load %arg3[%c0_102, %c0_103] : memref<1x1xf32, #tpu.memory_space<vmem>>, vector<1x1xf32>
    tpu.vector_store %arg3[%c0_102, %c0_103], %224 {strides = array<i32>} : memref<1x1xf32, #tpu.memory_space<vmem>>, vector<1x1xf32>,
    return
  }
}

</mosaic_0001>

<bundles_post_ra>
// kernel: tpu_custom_call.1
= control target key start
LH: loop header
LB: loop body
LE: loop exit
PB: predicated region body
PF: predicated region fallthrough
CT: control target
= control target key end

     0   :  { %9 = vsyncpa [#allocation5], 0  ;;  %s655_s0 = inlined_call_operand.hbm [shape: s32[32], index: 0, kind: input, shape index: {}]   ;;  %s656_s1 = inlined_call_operand.hbm [shape: f32[65,1,128], index: 1, kind: input, shape index: {}]   ;;  %s657_s2 = inlined_call_operand.hbm [shape: f32[16,128], index: 2, kind: output, shape index: {0}]   ;;  %s658_s3 = inlined_call_operand.hbm [shape: f32[1,1], index: 3, kind: output, shape index: {1}]  }
   0x1   :  { %10 = vsyncpa [#allocation3], 0 }
   0x2   :  { %11 = vsyncpa [#allocation4], 0 }
   0x3   :  { %12 = vsyncpa [#allocation9], 0  ;;  %s363_s14 = scalar_lea.hbm %s655_s0, 16 }
   0x4   :  { %p364_p0 = scmp.ne.s32.totalorder %s655_s0, %s363_s14  ;;  %p367_p1 = scmp.lt.u32.totalorder %s363_s14, %s655_s0 }
   0x6   :  { %p369_p2 = pnand %p367_p1, %p364_p0 }
   0x8   :  { %372 = shalt.err (!%p369_p2)
}
   0x9   :  { %s447_s19 = smov [#allocation2]   ;;  %s448_s22 = smov [#allocation6]  }
   0xa   :  { %20 = dma.hbm_to_smem %s655_s0, 16, %s447_s19, [#allocation5]  }
   0xb   :  { %s26_s23 = sshll.u32 %s448_s22, 4  ;;  %s373_s26 = scalar_lea.hbm %s656_s1, 1040  ;;  %s27_s23 = int_to_ptr.vmem [resolvable:$true] %s26_s23 }
   0xc   :  { %p374_p3 = scmp.ne.s32.totalorder %s656_s1, %s373_s26  ;;  %p377_p4 = scmp.lt.u32.totalorder %s373_s26, %s656_s1 }
   0xe   :  { %p379_p5 = pnand %p377_p4, %p374_p3 }
  0x10   :  { %382 = shalt.err (!%p379_p5)
}
  0x11   :  { %s383_s4 = scalar_lea.vmem %s27_s23, 1040  ;;  %s387_s0 = scalar_lea.vmem %s27_s23, 1056 }
  0x12   :  { %p384_p6 = scmp.ne.s32.totalorder %s27_s23, %s383_s4  ;;  %p388_p7 = scmp.lt.s32.totalorder %s27_s23, %s27_s23 }
  0x13   :  { %p389_p8 = scmp.lt.s32.totalorder %s387_s0, %s383_s4 }
  0x15   :  { %p390_p9 = por %p389_p8, %p388_p7 }
  0x17   :  { %p391_p10 = pnand %p390_p9, %p384_p6 }
  0x19   :  { %394 = shalt.err (!%p391_p10)
}
  0x1a   :  { %s449_s5 = smov 16   ;;  %s450_s6 = smov 1  }
  0x1b   :  { %32 = dma.hbm_to_vmem [thread:$0]  %s656_s1, 1040, %s27_s23, [#allocation3], %s449_s5, %s449_s5, %s450_s6  }
  0x1c   :  { %439 = dma.done.wait [#allocation5], 16  }
  0x1d   :  { %440 = vsyncadd [#allocation5], 4294967280 }
  0x1e   :  { %441 = dma.done.wait [#allocation3], 1040  }
  0x1f   :  { %442 = vsyncadd [#allocation3], 4294966256 }
  0x20   :  { %39 = sfence }
  0x21   :  { %s42_s9 = sld [smem:[#allocation2]]  ;;  %s317_s10 = sld [smem:[#allocation2 + $0x1]]  ;;  %v40_v18 = vlaneseq  ;;  %vm50_vm1 = vcmask 1040384  }
  0x22   :  { %s319_s11 = sld [smem:[#allocation2 + $0x2]]  ;;  %s321_s12 = sld [smem:[#allocation2 + $0x3]] }
  0x23   :  { %s323_s13 = sld [smem:[#allocation2 + $0x4]]  ;;  %s325_s14 = sld [smem:[#allocation2 + $0x5]]  ;;  %v565_v19 = vand.u32 127, %v40_v18 }
  0x24   :  { %s327_s15 = sld [smem:[#allocation2 + $0x6]]  ;;  %s329_s16 = sld [smem:[#allocation2 + $0x7]] }
  0x25   :  { %s499_s17 = sld [smem:[#allocation2 + $0x8]]  ;;  %s501_s18 = sld [smem:[#allocation2 + $0x9]] }
  0x26   :  { %s503_s19 = sld [smem:[#allocation2 + $0xa]]  ;;  %s505_s1 = sld [smem:[#allocation2 + $0xb]] }
  0x27   :  { %s44_s20 = scalar_lea.vmem [#allocation6], %s42_s9  ;;  %s57_s21 = scalar_lea.vmem [#allocation6], %s317_s10 }
  0x28   :  { %v507_v0 = vld [vmem:[%s44_s20] sm:$0x1]  ;;  %s69_s22 = scalar_lea.vmem [#allocation6], %s319_s11  ;;  %s81_s23 = scalar_lea.vmem [#allocation6], %s321_s12 }
  0x29   :  { %v509_v1 = vld [vmem:[%s57_s21] sm:$0x1]  ;;  %46 = vst [vmem:[#allocation7] sm:$0x1] %v507_v0  ;;  %s93_s24 = scalar_lea.vmem [#allocation6], %s323_s13  ;;  %s105_s25 = scalar_lea.vmem [#allocation6], %s325_s14 }
  0x2a   :  { %59 = vst [vmem:[#allocation7 + $0x1] sm:$0x1] %v509_v1  ;;  %v513_v2 = vld [vmem:[%s69_s22] sm:$0x1]  ;;  %s117_s26 = scalar_lea.vmem [#allocation6], %s327_s15  ;;  %s129_s27 = scalar_lea.vmem [#allocation6], %s329_s16 }
  0x2b   :  { %v515_v3 = vld [vmem:[%s81_s23] sm:$0x1]  ;;  %71 = vst [vmem:[#allocation7 + $0x2] sm:$0x1] %v513_v2  ;;  %s141_s28 = scalar_lea.vmem [#allocation6], %s499_s17  ;;  %s153_s29 = scalar_lea.vmem [#allocation6], %s501_s18 }
  0x2c   :  { %83 = vst [vmem:[#allocation7 + $0x3] sm:$0x1] %v515_v3  ;;  %v519_v4 = vld [vmem:[%s93_s24] sm:$0x1]  ;;  %s165_s30 = scalar_lea.vmem [#allocation6], %s503_s19  ;;  %s177_s4 = scalar_lea.vmem [#allocation6], %s505_s1 }
  0x2d   :  { %v521_v5 = vld [vmem:[%s105_s25] sm:$0x1]  ;;  %95 = vst [vmem:[#allocation7 + $0x4] sm:$0x1] %v519_v4  ;;  %s339_s0 = sld [smem:[#allocation2 + $0xc]]  ;;  %s341_s5 = sld [smem:[#allocation2 + $0xd]] }
  0x2e   :  { %107 = vst [vmem:[#allocation7 + $0x5] sm:$0x1] %v521_v5  ;;  %v525_v6 = vld [vmem:[%s117_s26] sm:$0x1]  ;;  %s343_s6 = sld [smem:[#allocation2 + $0xe]]  ;;  %s345_s7 = sld [smem:[#allocation2 + $0xf]] }
  0x2f   :  { %v527_v7 = vld [vmem:[%s129_s27] sm:$0x1]  ;;  %119 = vst [vmem:[#allocation7 + $0x6] sm:$0x1] %v525_v6  ;;  %s316_s12 = sld [smem:[#allocation2 + $0x10]]  ;;  %s318_s13 = sld [smem:[#allocation2 + $0x11]] }
  0x30   :  { %131 = vst [vmem:[#allocation7 + $0x7] sm:$0x1] %v527_v7  ;;  %v532_v8 = vld [vmem:[%s141_s28] sm:$0x1]  ;;  %s320_s14 = sld [smem:[#allocation2 + $0x12]]  ;;  %s322_s15 = sld [smem:[#allocation2 + $0x13]] }
  0x31   :  { %v535_v9 = vld [vmem:[%s153_s29] sm:$0x1]  ;;  %143 = vst [vmem:[#allocation7 + $0x8] sm:$0x1] %v532_v8  ;;  %s324_s16 = sld [smem:[#allocation2 + $0x14]]  ;;  %s326_s17 = sld [smem:[#allocation2 + $0x15]] }
  0x32   :  { %155 = vst [vmem:[#allocation7 + $0x9] sm:$0x1] %v535_v9  ;;  %v540_v10 = vld [vmem:[%s165_s30] sm:$0x1]  ;;  %s328_s18 = sld [smem:[#allocation2 + $0x16]]  ;;  %s330_s19 = sld [smem:[#allocation2 + $0x17]] }
  0x33   :  { %v543_v11 = vld [vmem:[%s177_s4] sm:$0x1]  ;;  %167 = vst [vmem:[#allocation7 + $0xa] sm:$0x1] %v540_v10  ;;  %s189_s8 = scalar_lea.vmem [#allocation6], %s339_s0  ;;  %s201_s9 = scalar_lea.vmem [#allocation6], %s341_s5 }
  0x34   :  { %179 = vst [vmem:[#allocation7 + $0xb] sm:$0x1] %v543_v11  ;;  %v550_v13 = vld [vmem:[%s189_s8] sm:$0x1]  ;;  %s213_s10 = scalar_lea.vmem [#allocation6], %s343_s6  ;;  %s225_s11 = scalar_lea.vmem [#allocation6], %s345_s7 }
  0x35   :  { %191 = vst [vmem:[#allocation7 + $0xc] sm:$0x1] %v550_v13  ;;  %v553_v14 = vld [vmem:[%s201_s9] sm:$0x1]  ;;  %v47_v20 = vstv %s316_s12  ;;  %v60_v23 = vstv %s318_s13  ;;  %s332_s1 = sld [smem:[#allocation2 + $0x18]]  ;;  %s334_s20 = sld [smem:[#allocation2 + $0x19]] }
  0x36   :  { %v555_v15 = vld [vmem:[%s213_s10] sm:$0x1]  ;;  %203 = vst [vmem:[#allocation7 + $0xd] sm:$0x1] %v553_v14  ;;  %vm48_vm0 = vcmp.eq.s32.totalorder %v565_v19, %v47_v20  ;;  %vm61_vm2 = vcmp.eq.s32.totalorder %v565_v19, %v60_v23  ;;  %v72_v26 = vstv %s320_s14  ;;  %v84_v29 = vstv %s322_s15  ;;  %s336_s21 = sld [smem:[#allocation2 + $0x1a]]  ;;  %s338_s22 = sld [smem:[#allocation2 + $0x1b]] }
  0x37   :  { %v547_v12 = vld [vmem:[#allocation7] sm:$0xff]  ;;  %215 = vst [vmem:[#allocation7 + $0xe] sm:$0x1] %v555_v15  ;;  %v559_v16 = vld [vmem:[%s225_s11] sm:$0x1]  ;;  %v49_v21 = vsel %vm48_vm0, %v507_v0, 0.0  ;;  %vm73_vm3 = vcmp.eq.s32.totalorder %v565_v19, %v72_v26  ;;  %vm85_vm4 = vcmp.eq.s32.totalorder %v565_v19, %v84_v29  ;;  %v96_v31 = vstv %s324_s16 }
  0x38   :  { %237 = vmax.xlane.f32.xlu0 %v547_v12  ;;  %227 = vst [vmem:[#allocation7 + $0xf] sm:$0x1] %v559_v16  ;;  %v51_v22 = vsel %vm50_vm1, %v49_v21, 0.0  ;;  %v62_v24 = vsel %vm61_vm2, %v509_v1, 0.0  ;;  %v74_v27 = vsel %vm73_vm3, %v513_v2, 0.0  ;;  %v86_v30 = vsel %vm85_vm4, %v515_v3, 0.0 }
  0x39   :  { %52 = vadd.xlane.f32.xlu1 %v51_v22  ;;  %v63_v25 = vsel %vm50_vm1, %v62_v24, 0.0  ;;  %v576_v28 = vsel %vm50_vm1, %v74_v27, 0.0  ;;  %v581_v32 = vsel %vm50_vm1, %v86_v30, 0.0  ;;  %vm97_vm5 = vcmp.eq.s32.totalorder %v565_v19, %v96_v31  ;;  %s340_s23 = sld [smem:[#allocation2 + $0x1c]]  ;;  %s342_s24 = sld [smem:[#allocation2 + $0x1d]] }
  0x3a   :  { %v98_v33 = vsel %vm97_vm5, %v519_v4, 0.0  ;;  %v108_v34 = vstv %s326_s17  ;;  %v120_v37 = vstv %s328_s18  ;;  %v132_v40 = vstv %s330_s19  ;;  %s344_s25 = sld [smem:[#allocation2 + $0x1e]]  ;;  %s346_s26 = sld [smem:[#allocation2 + $0x1f]] }
  0x3b   :  { %v99_v35 = vsel %vm50_vm1, %v98_v33, 0.0  ;;  %vm109_vm6 = vcmp.eq.s32.totalorder %v565_v19, %v108_v34  ;;  %vm121_vm7 = vcmp.eq.s32.totalorder %v565_v19, %v120_v37  ;;  %vm133_vm8 = vcmp.eq.s32.totalorder %v565_v19, %v132_v40  ;;  %s451_s27 = smov [#allocation7]  }
  0x3c   :  { %v110_v36 = vsel %vm109_vm6, %v521_v5, 0.0  ;;  %v122_v39 = vsel %vm121_vm7, %v525_v6, 0.0  ;;  %v134_v42 = vsel %vm133_vm8, %v527_v7, 0.0  ;;  %v144_v43 = vstv %s332_s1  ;;  %s273_s28 = sshll.u32 %s451_s27, 4  ;;  %s274_s28 = int_to_ptr.vmem [resolvable:$true] %s273_s28 }
  0x3d   :  { %64 = vadd.xlane.f32.xlu1 %v63_v25  ;;  %v111_v38 = vsel %vm50_vm1, %v110_v36, 0.0  ;;  %v123_v41 = vsel %vm50_vm1, %v122_v39, 0.0  ;;  %v135_v44 = vsel %vm50_vm1, %v134_v42, 0.0  ;;  %vm145_vm9 = vcmp.eq.s32.totalorder %v565_v19, %v144_v43  ;;  %s395_s29 = scalar_lea.vmem %s274_s28, 256  ;;  %p400_p12 = scmp.lt.s32.totalorder %s274_s28, %s274_s28 }
  0x3e   :  { %v146_v45 = vsel %vm145_vm9, %v532_v8, 0.0  ;;  %v156_v46 = vstv %s334_s20  ;;  %v168_v49 = vstv %s336_s21  ;;  %v180_v52 = vstv %s338_s22  ;;  %p396_p11 = scmp.ne.s32.totalorder %s274_s28, %s395_s29  ;;  %p401_p13 = scmp.lt.s32.totalorder %s395_s29, %s395_s29 }
  0x3f   :  { %v562_v17 = vld [vmem:[#allocation7 + $0x8] sm:$0xff]  ;;  %v147_v47 = vsel %vm50_vm1, %v146_v45, 0.0  ;;  %vm157_vm10 = vcmp.eq.s32.totalorder %v565_v19, %v156_v46  ;;  %vm169_vm11 = vcmp.eq.s32.totalorder %v565_v19, %v168_v49  ;;  %vm181_vm12 = vcmp.eq.s32.totalorder %v565_v19, %v180_v52 }
  0x40   :  { %239 = vmax.xlane.f32.xlu0 %v562_v17  ;;  %v158_v48 = vsel %vm157_vm10, %v535_v9, 0.0  ;;  %v170_v51 = vsel %vm169_vm11, %v540_v10, 0.0  ;;  %v182_v54 = vsel %vm181_vm12, %v543_v11, 0.0  ;;  %v192_v55 = vstv %s340_s23  ;;  %p402_p0 = por %p401_p13, %p400_p12 }
  0x41   :  { %v159_v50 = vsel %vm50_vm1, %v158_v48, 0.0  ;;  %v171_v53 = vsel %vm50_vm1, %v170_v51, 0.0  ;;  %v183_v56 = vsel %vm50_vm1, %v182_v54, 0.0  ;;  %vm193_vm13 = vcmp.eq.s32.totalorder %v565_v19, %v192_v55 }
  0x42   :  { %v194_v57 = vsel %vm193_vm13, %v550_v13, 0.0  ;;  %v204_v58 = vstv %s342_s24  ;;  %v216_v61 = vstv %s344_s25  ;;  %v228_v0 = vstv %s346_s26  ;;  %p403_p1 = pnand %p402_p0, %p396_p11 }
  0x43   :  { %v195_v59 = vsel %vm50_vm1, %v194_v57, 0.0  ;;  %vm205_vm14 = vcmp.eq.s32.totalorder %v565_v19, %v204_v58  ;;  %vm217_vm15 = vcmp.eq.s32.totalorder %v565_v19, %v216_v61  ;;  %vm229_vm0 = vcmp.eq.s32.totalorder %v565_v19, %v228_v0 }
  0x44   :  { %v206_v60 = vsel %vm205_vm14, %v553_v14, 0.0  ;;  %v218_v63 = vsel %vm217_vm15, %v555_v15, 0.0  ;;  %v230_v2 = vsel %vm229_vm0, %v559_v16, 0.0 }
  0x45   :  { %v207_v62 = vsel %vm50_vm1, %v206_v60, 0.0  ;;  %v219_v1 = vsel %vm50_vm1, %v218_v63, 0.0  ;;  %v231_v3 = vsel %vm50_vm1, %v230_v2, 0.0 }
  0xc5   :  { %v619_v4 = vpop.xlane.xlu0 %237 }
  0xc6   :  { %v241_v5 = vsub.f32 %v547_v12, %v619_v4 }
  0xc8   :  { %v243_v6 = vmul.f32 1.442695, %v241_v5 }
  0xca   :  { %355 = vpow2.f32 %v243_v6 }
  0xcd   :  { %v623_v7 = vpop.xlane.xlu0 %239 }
  0xce   :  { %v242_v8 = vsub.f32 %v562_v17, %v623_v7 }
  0xd0   :  { %v245_v9 = vmul.f32 1.442695, %v242_v8 }
  0xd2   :  { %357 = vpow2.f32 %v245_v9 }
  0xd4   :  { %v356_v10 = vpop.eup %355 }
  0xd5   :  { %247 = vadd.xlane.f32.xlu0 %v356_v10 }
  0xd9   :  { %76 = vadd.xlane.f32.xlu0 %v576_v28 }
  0xdc   :  { %v358_v11 = vpop.eup %357 }
  0xdd   :  { %100 = vadd.xlane.f32.xlu0 %v99_v35  ;;  %249 = vadd.xlane.f32.xlu1 %v358_v11 }
  0xe1   :  { %124 = vadd.xlane.f32.xlu0 %v123_v41  ;;  %88 = vadd.xlane.f32.xlu1 %v581_v32 }
  0xe5   :  { %148 = vadd.xlane.f32.xlu0 %v147_v47  ;;  %112 = vadd.xlane.f32.xlu1 %v111_v38 }
  0xe9   :  { %172 = vadd.xlane.f32.xlu0 %v171_v53  ;;  %136 = vadd.xlane.f32.xlu1 %v135_v44 }
  0xed   :  { %196 = vadd.xlane.f32.xlu0 %v195_v59  ;;  %160 = vadd.xlane.f32.xlu1 %v159_v50 }
  0xf1   :  { %220 = vadd.xlane.f32.xlu0 %v219_v1  ;;  %184 = vadd.xlane.f32.xlu1 %v183_v56 }
  0xf5   :  { %208 = vadd.xlane.f32.xlu1 %v207_v62 }
  0xf9   :  { %232 = vadd.xlane.f32.xlu1 %v231_v3 }
  0xfa   :  { %406 = shalt.err (!%p403_p1)
}
  0xfb   :  { %s407_s0 = scalar_lea.hbm %s657_s2, 256 }
  0xfc   :  { %p408_p2 = scmp.ne.s32.totalorder %s657_s2, %s407_s0  ;;  %p411_p3 = scmp.lt.u32.totalorder %s407_s0, %s657_s2 }
  0xfe   :  { %p413_p4 = pnand %p411_p3, %p408_p2 }
 0x100   :  { %416 = shalt.err (!%p413_p4)
}
 0x101   :  { %s452_s9 = smov 128   ;;  %s453_s10 = smov 8   ;;  %v53_v13 = vpop.xlane.xlu1 %52  ;;  %vm266_vm1 = vcmask 0  }
 0x102   :  { %279 = dma.vmem_to_hbm [thread:$0]  %s274_s28, 256, %s657_s2, [#allocation4], %s452_s9, %s452_s9, %s453_s10  }
 0x103   :  { %s454_s2 = smov [#allocation8]  }
 0x104   :  { %s286_s13 = sshll.u32 %s454_s2, 4  ;;  %s287_s13 = int_to_ptr.vmem [resolvable:$true] %s286_s13 }
 0x105   :  { %v65_v15 = vpop.xlane.xlu1 %64  ;;  %s417_s14 = scalar_lea.vmem %s287_s13, 16  ;;  %s421_s15 = scalar_lea.vmem %s287_s13, 32 }
 0x106   :  { %v66_v18 = vadd.f32 %v65_v15, %v53_v13  ;;  %p418_p5 = scmp.ne.s32.totalorder %s287_s13, %s417_s14  ;;  %p422_p6 = scmp.lt.s32.totalorder %s287_s13, %s287_s13 }
 0x107   :  { %p423_p7 = scmp.lt.s32.totalorder %s421_s15, %s417_s14 }
 0x109   :  { %p424_p8 = por %p423_p7, %p422_p6 }
 0x10b   :  { %p425_p9 = pnand %p424_p8, %p418_p5 }
 0x162   :  { %v248_v12 = vpop.xlane.xlu0 %247 }
 0x163   :  { %359 = vlog2.f32 %v248_v12 }
 0x166   :  { %v77_v14 = vpop.xlane.xlu0 %76 }
 0x167   :  { %v78_v20 = vadd.f32 %v77_v14, %v66_v18 }
 0x16a   :  { %v101_v16 = vpop.xlane.xlu0 %100  ;;  %v250_v17 = vpop.xlane.xlu1 %249 }
 0x16b   :  { %361 = vlog2.f32 %v250_v17 }
 0x16d   :  { %v360_v24 = vpop.eup %359 }
 0x16e   :  { %v125_v19 = vpop.xlane.xlu0 %124  ;;  %v89_v21 = vpop.xlane.xlu1 %88  ;;  %v252_v28 = vmul.f32 0.6931472, %v360_v24 }
 0x16f   :  { %v90_v22 = vadd.f32 %v89_v21, %v78_v20 }
 0x170   :  { %v255_v35 = vadd.f32 %v252_v28, %v619_v4 }
 0x171   :  { %v102_v25 = vadd.f32 %v101_v16, %v90_v22 }
 0x172   :  { %v149_v23 = vpop.xlane.xlu0 %148  ;;  %v113_v26 = vpop.xlane.xlu1 %112 }
 0x173   :  { %v114_v27 = vadd.f32 %v113_v26, %v102_v25 }
 0x175   :  { %v362_v29 = vpop.eup %361  ;;  %v126_v30 = vadd.f32 %v125_v19, %v114_v27 }
 0x176   :  { %v254_v31 = vmul.f32 0.6931472, %v362_v29  ;;  %v137_v32 = vpop.xlane.xlu1 %136  ;;  %v173_v33 = vpop.xlane.xlu0 %172 }
 0x177   :  { %v138_v34 = vadd.f32 %v137_v32, %v126_v30 }
 0x178   :  { %v256_v36 = vadd.f32 %v254_v31, %v623_v7 }
 0x179   :  { %v150_v37 = vadd.f32 %v149_v23, %v138_v34 }
 0x17a   :  { %v257_v38 = vadd.f32 %v256_v36, %v255_v35  ;;  %v161_v39 = vpop.xlane.xlu1 %160  ;;  %v197_v42 = vpop.xlane.xlu0 %196 }
 0x17b   :  { %v162_v40 = vadd.f32 %v161_v39, %v150_v37 }
 0x17c   :  { %v258_v41 = vrot.slane %v257_v38, 4 }
 0x17d   :  { %v174_v43 = vadd.f32 %v173_v33, %v162_v40 }
 0x17e   :  { %v185_v44 = vpop.xlane.xlu1 %184  ;;  %v259_v45 = vadd.f32 %v258_v41, %v257_v38  ;;  %v221_v50 = vpop.xlane.xlu0 %220 }
 0x17f   :  { %v186_v46 = vadd.f32 %v185_v44, %v174_v43 }
 0x180   :  { %v260_v47 = vrot.slane %v259_v45, 2 }
 0x181   :  { %v198_v48 = vadd.f32 %v197_v42, %v186_v46 }
 0x182   :  { %v209_v49 = vpop.xlane.xlu1 %208  ;;  %v261_v51 = vadd.f32 %v260_v47, %v259_v45 }
 0x183   :  { %v210_v52 = vadd.f32 %v209_v49, %v198_v48 }
 0x184   :  { %v262_v53 = vrot.slane %v261_v51, 1 }
 0x185   :  { %v222_v54 = vadd.f32 %v221_v50, %v210_v52 }
 0x186   :  { %v263_v55 = vadd.f32 %v262_v53, %v261_v51  ;;  %v233_v56 = vpop.xlane.xlu1 %232 }
 0x187   :  { %v234_v57 = vadd.f32 %v233_v56, %v222_v54 }
 0x189   :  { %v264_v58 = vsub.f32 %v263_v55, %v234_v57 }
 0x18b   :  { %v265_v59 = vmul.f32 0.0625, %v264_v58 }
 0x18d   :  { %267 = vst.msk [vmem:[#allocation8] sm:$0x1] %vm266_vm1, %v265_v59 }
 0x18e   :  { %428 = shalt.err (!%p425_p9)
}
 0x18f   :  { %s429_s18 = scalar_lea.hbm %s658_s3, 16 }
 0x190   :  { %p430_p10 = scmp.ne.s32.totalorder %s658_s3, %s429_s18  ;;  %p433_p11 = scmp.lt.u32.totalorder %s429_s18, %s658_s3 }
 0x192   :  { %p435_p12 = pnand %p433_p11, %p430_p10 }
 0x194   :  { %438 = shalt.err (!%p435_p12)
}
 0x195   :  { %289 = dma.vmem_to_hbm [thread:$0]  %s287_s13, 16, %s658_s3, [#allocation9]  }
 0x196   :  { %443 = dma.done.wait [#allocation4], 256  }
 0x197   :  { %444 = vsyncadd [#allocation4], 4294967040 }
 0x198   :  { %445 = dma.done.wait [#allocation9], 16  }
 0x199   :  { %446 = vsyncadd [#allocation9], 4294967280 }
 0x19a   :  { %296 = vsyncpa [#allocation3], 1 }
 0x19b   :  { %297 = vsyncpa [#allocation4], 1 }
 0x19c   :  { %298 = vsyncpa [#allocation9], 1 }
 0x19d   :  { %299 = vsyncpa [#allocation5], 1 }

</bundles_post_ra>
